<compile_context>
chip_gen: v7x
topology: tpu7x:2x2x1
jax: 0.10.0
libtpu: 0.0.40
codegen_flags: <defaults>
</compile_context>

<pallas_src>
import math

import jax
import jax.numpy as jnp
from jax.experimental import pallas as pl
from jax.experimental.pallas import tpu as pltpu  # noqa: F401  (TPU backend)


def _make_kernel(half, time_factor, max_period):
    """Bakes the sinusoid constants into the kernel at trace time."""
    log_coef = -math.log(max_period) / half  # freqs[j] = exp(log_coef * j)

    def kernel(t_ref, w1_ref, b_ref, w2_ref, out_ref):
        # t_ref: (N, 1) f32; w1_ref: (2*half, H) bf16; b_ref: (2, H) f32
        # w2_ref: (H, H) bf16; out_ref: (N, H) f32

        # Frequencies rebuilt in-kernel: one iota + one EUP exp on a single
        # vreg row — cheaper than a dedicated DMA descriptor for a 512 B table.
        j = jax.lax.broadcasted_iota(jnp.int32, (1, half), 1).astype(jnp.float32)
        freqs = time_factor * jnp.exp(log_coef * j)              # (1, half) f32

        args = t_ref[...] * freqs                                # (N, half) f32

        # Keep cos/sin in f32 (v5e VPU/EUP have no bf16 datapath); cast to
        # bf16 only right before the MXU dot. Single K=2*half dot: the concat
        # is a couple of vreg copies at this size, and one K=256 push fills
        # the 256-wide MXU (v6e/v7x) once instead of twice.
        emb = jnp.concatenate([jnp.cos(args), jnp.sin(args)],
                              axis=-1).astype(w1_ref.dtype)       # (N, 2*half) bf16

        h = (jnp.dot(emb, w1_ref[...], preferred_element_type=jnp.float32)
             + b_ref[0:1, :])                                     # (N, H) f32
        h = h * jax.nn.sigmoid(h)                                 # SiLU in f32 (EUP)

        out = (jnp.dot(h.astype(w2_ref.dtype), w2_ref[...],
                       preferred_element_type=jnp.float32)
               + b_ref[1:2, :])                                   # (N, H) f32
        out_ref[...] = out.astype(out_ref.dtype)

    return kernel


def prepare_params(w1, b1, w2, b2, *, weight_dtype=jnp.bfloat16):
    """One-time parameter prep (do NOT run per forward call)."""
    dim = w1.shape[0]
    half = dim // 2
    # If dim is odd, the PyTorch reference zero-pads the embedding; that padded
    # column multiplies W1's last row by zero, so we just drop it.
    w1_c = w1[:2 * half].astype(weight_dtype)                     # (2*half, H)
    w2_c = w2.astype(weight_dtype)                                # (H, H)
    b_packed = jnp.stack([b1, b2], axis=0).astype(jnp.float32)    # (2, H)
    return w1_c, b_packed, w2_c


def timestep_embedder_forward(t, prepared, *, time_factor=1.0,
                              max_period=10000.0):
    """t: (N,) float; prepared: output of prepare_params. Returns (N, H) f32."""
    w1_c, b_packed, w2_c = prepared
    n = t.shape[0]
    half = w1_c.shape[0] // 2
    hidden = w2_c.shape[1]

    t2d = t.astype(jnp.float32).reshape(n, 1)
    kernel = _make_kernel(half, time_factor, max_period)

    def full(shape):
        return pl.BlockSpec(shape, lambda: (0,) * len(shape))

    # Advisory cost estimate so XLA can overlap this tiny call with other work.
    flops = 2 * n * (2 * half * hidden + hidden * hidden)
    transcendentals = half + n * (2 * half + hidden)   # exp(freqs) + cos/sin + sigmoid
    bytes_accessed = int(
        (w1_c.size + w2_c.size) * jnp.dtype(w1_c.dtype).itemsize
        + (b_packed.size + n * 1 + n * hidden) * 4)

    return pl.pallas_call(
        kernel,
        out_shape=jax.ShapeDtypeStruct((n, hidden), jnp.float32),
        in_specs=[
            full(t2d.shape),
            full(w1_c.shape),
            full(b_packed.shape),
            full(w2_c.shape),
        ],
        out_specs=full((n, hidden)),
        cost_estimate=pl.CostEstimate(flops=flops,
                                      transcendentals=transcendentals,
                                      bytes_accessed=bytes_accessed),
        # Gridless single-TC on purpose: a grid / v7x 2-core split at these
        # sizes duplicates weight DMA and adds per-step overhead for no gain.
    )(t2d, w1_c, b_packed, w2_c)


def make_params(key, frequency_embedding_size=256, hidden_size=128):
    """Deterministic synthetic params mirroring TimestepEmbedder.__init__ shapes."""
    k1, k2, k3, k4 = jax.random.split(key, 4)
    # nn.init.normal_(std=0.02) for the two Linear weights (initialize_weights()).
    # Stored as (in, out), i.e. transposed vs. PyTorch's (out, in).
    w1 = 0.02 * jax.random.normal(k1, (frequency_embedding_size, hidden_size),
                                  dtype=jnp.float32)
    w2 = 0.02 * jax.random.normal(k2, (hidden_size, hidden_size),
                                  dtype=jnp.float32)
    b1 = 0.01 * jax.random.uniform(k3, (hidden_size,), dtype=jnp.float32,
                                   minval=-1.0, maxval=1.0)
    b2 = 0.01 * jax.random.uniform(k4, (hidden_size,), dtype=jnp.float32,
                                   minval=-1.0, maxval=1.0)
    return w1, b1, w2, b2


def reference_forward(t, w1, b1, w2, b2, *, frequency_embedding_size,
                      time_factor=1.0, max_period=10000.0):
    """Pure-JAX f32 reference matching the PyTorch module."""
    half = frequency_embedding_size // 2
    freqs = jnp.exp(-math.log(max_period)
                    * jnp.arange(half, dtype=jnp.float32) / half)
    tf = time_factor * t.astype(jnp.float32)
    args = tf[:, None] * freqs[None, :]
    emb = jnp.concatenate([jnp.cos(args), jnp.sin(args)], axis=-1)
    if frequency_embedding_size % 2:
        emb = jnp.concatenate([emb, jnp.zeros_like(emb[:, :1])], axis=-1)
    h = emb @ w1 + b1
    h = h * jax.nn.sigmoid(h)
    return h @ w2 + b2


if __name__ == "__main__":
    key = jax.random.PRNGKey(0)
    k_t, k_p = jax.random.split(key)

    batch = 8
    frequency_embedding_size = 256
    hidden_size = 128
    time_factor = 1.0

    # Timesteps: one scalar per batch element, e.g. in [0, 1000).
    t = jax.random.uniform(k_t, (batch,), dtype=jnp.float32,
                           minval=0.0, maxval=1000.0)

    w1, b1, w2, b2 = make_params(k_p, frequency_embedding_size, hidden_size)

    # One-time setup (hoisted out of the per-call path).
    prepared = prepare_params(w1, b1, w2, b2)
    prepared = jax.block_until_ready(prepared)

    out = timestep_embedder_forward(t, prepared, time_factor=time_factor)
    out = jax.block_until_ready(out)

    ref = reference_forward(t, w1, b1, w2, b2,
                            frequency_embedding_size=frequency_embedding_size,
                            time_factor=time_factor)
    assert out.shape == (batch, hidden_size)
    # bf16 weights + bf16 MXU inputs => slightly looser tolerance vs f32 ref.
    assert jnp.allclose(out, ref, atol=2e-2, rtol=2e-2), (
        float(jnp.max(jnp.abs(out - ref))))

    print("KERNEL_OK")
</pallas_src>

<mosaic_0001>
module attributes {stable_mosaic.version = 11 : i64} {
  func.func @kernel(%arg0: memref<8x1xf32, #tpu.memory_space<vmem>>, %arg1: memref<256x128xbf16, #tpu.memory_space<vmem>>, %arg2: memref<2x128xf32, #tpu.memory_space<vmem>>, %arg3: memref<128x128xbf16, #tpu.memory_space<vmem>>, %arg4: memref<8x128xf32, #tpu.memory_space<vmem>>) attributes {dimension_semantics = [], scalar_prefetch = 0 : i64, scratch_operands = 0 : i64, tpu.core_type = #tpu.core_type<tc>} {
    %0 = tpu.iota {dimensions = array<i32: 1>} : vector<1x128xi32>
    %1 = arith.sitofp %0 : vector<1x128xi32> to vector<1x128xf32>
    %cst = arith.constant -0.0719557852 : f32
    %2 = vector.broadcast %cst : f32 to vector<1x128xf32>
    %3 = arith.mulf %2, %1 : vector<1x128xf32>
    %4 = math.exp %3 : vector<1x128xf32>
    %cst_0 = arith.constant 1.000000e+00 : f32
    %5 = vector.broadcast %cst_0 : f32 to vector<1x128xf32>
    %6 = arith.mulf %5, %4 : vector<1x128xf32>
    %c0 = arith.constant 0 : index
    %c0_1 = arith.constant 0 : index
    %7 = vector.load %arg0[%c0, %c0_1] : memref<8x1xf32, #tpu.memory_space<vmem>>, vector<8x1xf32>
    %8 = vector.broadcast %7 : vector<8x1xf32> to vector<8x128xf32>
    %9 = vector.broadcast %6 : vector<1x128xf32> to vector<8x128xf32>
    %10 = arith.mulf %8, %9 : vector<8x128xf32>
    %11 = math.cos %10 : vector<8x128xf32>
    %12 = math.sin %10 : vector<8x128xf32>
    %13 = tpu.concatenate %11, %12 in 1 : vector<8x128xf32>, vector<8x128xf32> -> vector<8x256xf32>
    %14 = arith.truncf %13 : vector<8x256xf32> to vector<8x256xbf16>
    %c0_2 = arith.constant 0 : index
    %c0_3 = arith.constant 0 : index
    %15 = vector.load %arg1[%c0_2, %c0_3] : memref<256x128xbf16, #tpu.memory_space<vmem>>, vector<256x128xbf16>
    %cst_4 = arith.constant dense<0.000000e+00> : vector<8x128xf32>
    %16 = tpu.matmul %14, %15, %cst_4 {dimension_numbers = #tpu.dot_dimension_numbers<[1], [0], [0], [1], [0, 0, 1, 1], [], []>} : vector<8x256xbf16>, vector<256x128xbf16>, vector<8x128xf32> -> vector<8x128xf32>
    %c0_5 = arith.constant 0 : index
    %c0_6 = arith.constant 0 : index
    %17 = vector.load %arg2[%c0_5, %c0_6] : memref<2x128xf32, #tpu.memory_space<vmem>>, vector<1x128xf32>
    %18 = vector.broadcast %17 : vector<1x128xf32> to vector<8x128xf32>
    %19 = arith.addf %16, %18 : vector<8x128xf32>
    %20 = arith.negf %19 : vector<8x128xf32>
    %21 = math.exp %20 : vector<8x128xf32>
    %cst_7 = arith.constant 1.000000e+00 : f32
    %22 = vector.broadcast %cst_7 : f32 to vector<8x128xf32>
    %23 = arith.addf %22, %21 : vector<8x128xf32>
    %24 = arith.divf %22, %23 : vector<8x128xf32>
    %25 = arith.mulf %19, %24 : vector<8x128xf32>
    %26 = arith.truncf %25 : vector<8x128xf32> to vector<8x128xbf16>
    %c0_8 = arith.constant 0 : index
    %c0_9 = arith.constant 0 : index
    %27 = vector.load %arg3[%c0_8, %c0_9] : memref<128x128xbf16, #tpu.memory_space<vmem>>, vector<128x128xbf16>
    %cst_10 = arith.constant dense<0.000000e+00> : vector<8x128xf32>
    %28 = tpu.matmul %26, %27, %cst_10 {dimension_numbers = #tpu.dot_dimension_numbers<[1], [0], [0], [1], [0, 0, 1, 1], [], []>} : vector<8x128xbf16>, vector<128x128xbf16>, vector<8x128xf32> -> vector<8x128xf32>
    %c1 = arith.constant 1 : index
    %c0_11 = arith.constant 0 : index
    %29 = vector.load %arg2[%c1, %c0_11] : memref<2x128xf32, #tpu.memory_space<vmem>>, vector<1x128xf32>
    %30 = vector.broadcast %29 : vector<1x128xf32> to vector<8x128xf32>
    %31 = arith.addf %28, %30 : vector<8x128xf32>
    %c0_12 = arith.constant 0 : index
    %c0_13 = arith.constant 0 : index
    %32 = vector.load %arg4[%c0_12, %c0_13] : memref<8x128xf32, #tpu.memory_space<vmem>>, vector<8x128xf32>
    tpu.vector_store %arg4[%c0_12, %c0_13], %31 {strides = array<i32>} : memref<8x128xf32, #tpu.memory_space<vmem>>, vector<8x128xf32>,
    return
  }
}

</mosaic_0001>

<bundles_post_ra>
// kernel: tpu_custom_call.1
= control target key start
LH: loop header
LB: loop body
LE: loop exit
PB: predicated region body
PF: predicated region fallthrough
CT: control target
= control target key end

     0   :  { %9 = vsyncpa [#allocation3], 0  ;;  %s892_s0 = inlined_call_operand.vmem [shape: f32[8,1], index: 0, kind: input, shape index: {}]   ;;  %s893_s1 = inlined_call_operand.hbm [shape: bf16[256,128], index: 1, kind: input, shape index: {}]   ;;  %s894_s2 = inlined_call_operand.vmem [shape: f32[2,128], index: 2, kind: input, shape index: {}]   ;;  %s895_s3 = inlined_call_operand.hbm [shape: bf16[128,128], index: 3, kind: input, shape index: {}]   ;;  %s896_s4 = inlined_call_operand.hbm [shape: f32[8,128], index: 4, kind: output, shape index: {}]  }
   0x1   :  { %10 = vsyncpa [#allocation6], 0 }
   0x2   :  { %11 = vsyncpa [#allocation4], 0  ;;  %s787_s15 = smov [#allocation2]   ;;  %s715_s19 = scalar_lea.hbm %s893_s1, 2048 }
   0x3   :  { %s19_s16 = sshll.u32 %s787_s15, 4  ;;  %p716_p0 = scmp.ne.s32.totalorder %s893_s1, %s715_s19  ;;  %s20_s16 = int_to_ptr.vmem [resolvable:$true] %s19_s16 }
   0x4   :  { %p719_p1 = scmp.lt.u32.totalorder %s715_s19, %s893_s1 }
   0x6   :  { %p721_p2 = pnand %p719_p1, %p716_p0 }
   0x8   :  { %724 = shalt.err (!%p721_p2)
}
   0x9   :  { %s725_s24 = scalar_lea.vmem %s20_s16, 2048  ;;  %p730_p4 = scmp.lt.s32.totalorder %s20_s16, %s20_s16 }
   0xa   :  { %p726_p3 = scmp.ne.s32.totalorder %s20_s16, %s725_s24  ;;  %p731_p5 = scmp.lt.s32.totalorder %s725_s24, %s725_s24 }
   0xc   :  { %p732_p6 = por %p731_p5, %p730_p4 }
   0xe   :  { %p733_p7 = pnand %p732_p6, %p726_p3 }
  0x10   :  { %736 = shalt.err (!%p733_p7)
}
  0x11   :  { %s788_s25 = smov 64   ;;  %s789_s26 = smov 4  }
  0x12   :  { %25 = dma.hbm_to_vmem [thread:$0]  %s893_s1, 2048, %s20_s16, [#allocation3], %s788_s25, %s788_s25, %s789_s26  }
  0x13   :  { %s790_s29 = smov [#allocation5]   ;;  %s737_s7 = scalar_lea.hbm %s895_s3, 1024 }
  0x14   :  { %s33_s30 = sshll.u32 %s790_s29, 4  ;;  %p738_p8 = scmp.ne.s32.totalorder %s895_s3, %s737_s7  ;;  %s34_s30 = int_to_ptr.vmem [resolvable:$true] %s33_s30 }
  0x15   :  { %p741_p9 = scmp.lt.u32.totalorder %s737_s7, %s895_s3 }
  0x17   :  { %p743_p10 = pnand %p741_p9, %p738_p8 }
  0x19   :  { %746 = shalt.err (!%p743_p10)
}
  0x1a   :  { %s747_s12 = scalar_lea.vmem %s34_s30, 1024  ;;  %p752_p12 = scmp.lt.s32.totalorder %s34_s30, %s34_s30 }
  0x1b   :  { %p748_p11 = scmp.ne.s32.totalorder %s34_s30, %s747_s12  ;;  %p753_p13 = scmp.lt.s32.totalorder %s747_s12, %s747_s12 }
  0x1d   :  { %p754_p0 = por %p753_p13, %p752_p12 }
  0x1f   :  { %p755_p1 = pnand %p754_p0, %p748_p11 }
  0x21   :  { %758 = shalt.err (!%p755_p1)
}
  0x22   :  { %39 = dma.hbm_to_vmem [thread:$0]  %s895_s3, 1024, %s34_s30, [#allocation6], %s788_s25, %s788_s25, %s789_s26  }
  0x23   :  { %781 = dma.done.wait [#allocation3], 2048  }
  0x24   :  { %782 = vsyncadd [#allocation3], 4294965248 }
  0x25   :  { %783 = dma.done.wait [#allocation6], 1024  }
  0x26   :  { %784 = vsyncadd [#allocation6], 4294966272  ;;  %v791_v0 = vmov 0   ;;  %v53_v1 = vld [vmem:[%s892_s0] sm:$0xff]  ;;  %v681_v2 = vld [vmem:[#allocation2 + $0x40] sm:$0xff]   ;;  %v47_v18 = vlaneseq  ;;  %s800_s18 = smov [#allocation7]  }
  0x27   :  { %680 = vset.pattern.permute.xlu0 %v791_v0  ;;  %v682_v3 = vld [vmem:[#allocation2] sm:$0xff]   ;;  %v683_v4 = vld [vmem:[#allocation2 + $0x48] sm:$0xff]   ;;  %611 = vmatprep.subr.bf16.mxu0 %v681_v2  ;;  %v685_v6 = vld [vmem:[#allocation2 + $0x50] sm:$0xff]   ;;  %v792_v37 = vmov 2102212464   ;;  %s566_s19 = sshll.u32 %s800_s18, 4  ;;  %s567_s19 = int_to_ptr.vmem [resolvable:$true] %s566_s19 }
  0x28   :  { %56 = vperm.xlu0 %680, %v53_v1   ;;  %612 = vmatpush3.bf16.msra.mxu0 %v682_v3  ;;  %v684_v5 = vld [vmem:[#allocation2 + $0x8] sm:$0xff]   ;;  %v686_v7 = vld [vmem:[#allocation2 + $0x10] sm:$0xff]   ;;  %v687_v8 = vld [vmem:[#allocation2 + $0x58] sm:$0xff]   ;;  %v48_v19 = vand.u32 127, %v47_v18  ;;  %v793_v39 = vmov 920167782   ;;  %p764_p3 = scmp.lt.s32.totalorder %s567_s19, %s567_s19 }
  0x29   :  { %613 = vmatprep.subr.bf16.mxu0 %v683_v4  ;;  %v688_v9 = vld [vmem:[#allocation2 + $0x18] sm:$0xff]   ;;  %v689_v10 = vld [vmem:[#allocation2 + $0x60] sm:$0xff]   ;;  %v691_v12 = vld [vmem:[#allocation2 + $0x68] sm:$0xff]   ;;  %v794_v43 = vmov 1326507024   ;;  %s759_s20 = scalar_lea.vmem %s567_s19, 128 }
  0x2a   :  { %v690_v11 = vld [vmem:[#allocation2 + $0x20] sm:$0xff]   ;;  %v692_v13 = vld [vmem:[#allocation2 + $0x28] sm:$0xff]   ;;  %v693_v14 = vld [vmem:[#allocation2 + $0x70] sm:$0xff]   ;;  %v49_v20 = vcvt.s32.f32 %v48_v19  ;;  %v795_v45 = vmov 683565275   ;;  %p760_p2 = scmp.ne.s32.totalorder %s567_s19, %s759_s20  ;;  %p765_p4 = scmp.lt.s32.totalorder %s759_s20, %s759_s20 }
  0x2b   :  { %v694_v15 = vld [vmem:[#allocation2 + $0x30] sm:$0xff]   ;;  %v695_v16 = vld [vmem:[#allocation2 + $0x78] sm:$0xff]   ;;  %v796_v47 = vmov 2475754826   ;;  %v797_v50 = vmov 2131351028  }
  0x2c   :  { %614 = vmatpush3.bf16.msra.mxu0 %v684_v5  ;;  %v696_v17 = vld [vmem:[#allocation2 + $0x38] sm:$0xff]   ;;  %v50_v21 = vmul.f32 -0.071955785, %v49_v20  ;;  %p766_p5 = por %p765_p4, %p764_p3 }
  0x2d   :  { %615 = vmatprep.subr.bf16.mxu0 %v685_v6 }
  0x2e   :  { %v51_v22 = vmul.f32 1.442695, %v50_v21  ;;  %p767_p6 = pnand %p766_p5, %p760_p2 }
  0x30   :  { %616 = vmatpush3.bf16.msra.mxu0 %v686_v7  ;;  %705 = vpow2.f32 %v51_v22 }
  0x31   :  { %617 = vmatprep.subr.bf16.mxu0 %v687_v8 }
  0x34   :  { %618 = vmatpush3.bf16.msra.mxu0 %v688_v9 }
  0x35   :  { %619 = vmatprep.subr.bf16.mxu0 %v689_v10 }
  0x38   :  { %620 = vmatpush3.bf16.msra.mxu0 %v690_v11 }
  0x39   :  { %621 = vmatprep.subr.bf16.mxu0 %v691_v12 }
  0x3a   :  { %v706_v23 = vpop.eup %705 }
  0x3c   :  { %622 = vmatpush3.bf16.msra.mxu0 %v692_v13 }
  0x3d   :  { %623 = vmatprep.subr.bf16.mxu0 %v693_v14 }
  0x40   :  { %624 = vmatpush3.bf16.msra.mxu0 %v694_v15 }
  0x41   :  { %625 = vmatprep.subr.bf16.mxu0 %v695_v16 }
  0x44   :  { %626 = vmatpush3.bf16.msra.mxu0 %v696_v17 }
  0xa7   :  { %v57_v24 = vpop.permute.xlu0 %56 }
  0xa8   :  { %v853_v25 = vmul.f32 %v706_v23, %v57_v24 }
  0xaa   :  { %v63_v26 = vand.u32 2139095040, %v853_v25  ;;  %v60_v27 = vand.u32 2147483647, %v853_v25  ;;  %vm62_vm7 = vcmp.lt.s32.totalorder %v853_v25, 0  ;;  %vm152_vm15 = vweird.f32 %v853_v25 }
  0xac   :  { %v64_v28 = vshrl.u32 %v63_v26, 23  ;;  %v67_v30 = vand.u32 8388607, %v60_v27  ;;  %vm61_vm8 = vcmp.le.f32.partialorder %v60_v27, 0.7853982 }
  0xae   :  { %v576_v29 = vadd.s32 4294967169, %v64_v28  ;;  %v68_v33 = vor.u32 8388608, %v67_v30 }
  0xb0   :  { %v70_v31 = vadd.s32 1, %v576_v29  ;;  %v108_v41 = vshll.u32 %v68_v33, 8 }
  0xb2   :  { %vm71_vm0 = vcmp.gt.s32.totalorder %v70_v31, 0 }
  0xb3   :  { %v72_v32 = vsel %vm71_vm0, %v70_v31, 0  ;;  %vm799_vm0 = vmmov 0  }
  0xb4   :  { %v74_v34 = vand.u32 31, %v72_v32  ;;  %v73_v35 = vshrl.u32 %v72_v32, 5 }
  0xb6   :  { %v75_v36 = vsub.s32 32, %v74_v34  ;;  %v86_v38 = vshll.u32 %v792_v37, %v74_v34  ;;  %v89_v40 = vshll.u32 %v793_v39, %v74_v34  ;;  %v77_v46 = vshll.u32 %v795_v45, %v74_v34 }
  0xb7   :  { %v80_v49 = vshll.u32 %v796_v47, %v74_v34  ;;  %v83_v52 = vshll.u32 %v797_v50, %v74_v34  ;;  %vm95_vm1 = vcmp.lt.s32.totalorder %v73_v35, 4  ;;  %vm92_vm2 = vcmp.lt.s32.totalorder %v73_v35, 1 }
  0xb8   :  { %v87_v42 = vshrl.u32 %v793_v39, %v75_v36  ;;  %v90_v44 = vshrl.u32 %v794_v43, %v75_v36  ;;  %v78_v48 = vshrl.u32 %v796_v47, %v75_v36  ;;  %v81_v51 = vshrl.u32 %v797_v50, %v75_v36 }
  0xb9   :  { %v84_v53 = vshrl.u32 %v792_v37, %v75_v36  ;;  %v76_v57 = vshrl.u32 %v795_v45, %v75_v36  ;;  %vm93_vm3 = vcmp.lt.s32.totalorder %v73_v35, 2  ;;  %vm94_vm4 = vcmp.lt.s32.totalorder %v73_v35, 3 }
  0xba   :  { %v88_v54 = vor.u32 %v87_v42, %v86_v38  ;;  %v91_v55 = vor.u32 %v90_v44, %v89_v40  ;;  %v79_v56 = vor.u32 %v78_v48, %v77_v46  ;;  %v82_v58 = vor.u32 %v81_v51, %v80_v49 }
  0xbb   :  { %v85_v59 = vor.u32 %v84_v53, %v83_v52 }
  0xbc   :  { %v101_v60 = vsel %vm95_vm1, %v88_v54, 920167782  ;;  %v105_v61 = vsel %vm95_vm1, %v91_v55, 1326507024  ;;  %v100_v63 = vsel %vm92_vm2, %v79_v56, %v82_v58  ;;  %v96_v2 = vsel %vm92_vm2, %v76_v57, %v79_v56 }
  0xbd   :  { %v97_v62 = vsel %vm95_vm1, %v85_v59, 2102212464  ;;  %v102_v0 = vsel %vm94_vm4, %v85_v59, %v101_v60  ;;  %v104_v1 = vsel %vm92_vm2, %v82_v58, %v85_v59  ;;  %v106_v5 = vsel %vm94_vm4, %v88_v54, %v105_v61  ;;  %v697_v61 = vld [vmem:[#allocation5] sm:$0xff]  }
  0xbe   :  { %v98_v3 = vsel %vm94_vm4, %v82_v58, %v97_v62  ;;  %v103_v4 = vsel %vm93_vm3, %v100_v63, %v102_v0  ;;  %v107_v6 = vsel %vm93_vm3, %v104_v1, %v106_v5  ;;  %v798_v62 = vmov 0.0   ;;  %v698_v63 = vld [vmem:[#allocation5 + $0x8] sm:$0xff]   ;;  %v699_v0 = vld [vmem:[#allocation5 + $0x10] sm:$0xff]   ;;  %v701_v1 = vld [vmem:[#allocation5 + $0x20] sm:$0xff]  }
  0xbf   :  { %v859_v7 = vmul.u32.u64.low %v108_v41, %v103_v4  ;;  %v860_v8 = vmul.u32.u64.high %v108_v41, %v103_v4, %v859_v7  ;;  %v862_v9 = vmul.u32.u64.low %v108_v41, %v107_v6  ;;  %v863_v10 = vmul.u32.u64.high %v108_v41, %v107_v6, %v862_v9  ;;  %642 = vmatprep.subr.bf16.mxu1 %v798_v62  ;;  %658 = vmatprep.mubr.msk.bf16.mxu1 %vm799_vm0, %v798_v62  ;;  %v704_v4 = vld [vmem:[#allocation5 + $0x38] sm:$0xff]   ;;  %v584_v6 = vld [vmem:[%s894_s2] ss:$0 sm:$0xff] }
  0xc0   :  { %v99_v11 = vsel %vm93_vm3, %v96_v2, %v98_v3  ;;  %643 = vmatpush3.bf16.msra.mxu1 %v697_v61  ;;  %v702_v2 = vld [vmem:[#allocation5 + $0x28] sm:$0xff]   ;;  %v703_v3 = vld [vmem:[#allocation5 + $0x30] sm:$0xff]  }
  0xc1   :  { %v118_v12 = vadd.s32 1, %v860_v8  ;;  %v115_v13 = vmul.u32 %v108_v41, %v99_v11  ;;  %vm117_vm5 = vc.u32 %v863_v10, %v859_v7  ;;  %v116_v26 = vadd.s32 %v859_v7, %v863_v10  ;;  %644 = vmatprep.subr.bf16.mxu1 %v798_v62 }
  0xc3   :  { %v119_v14 = vsel %vm117_vm5, %v118_v12, %v860_v8 }
  0xc4   :  { %v120_v15 = vadd.s32 %v119_v14, %v115_v13  ;;  %645 = vmatpush3.bf16.msra.mxu1 %v698_v63 }
  0xc5   :  { %646 = vmatprep.subr.bf16.mxu1 %v798_v62 }
  0xc6   :  { %v121_v16 = vadd.s32 536870912, %v120_v15 }
  0xc8   :  { %v122_v17 = vshrl.u32 %v121_v16, 30  ;;  %647 = vmatpush3.bf16.msra.mxu1 %v699_v0 }
  0xc9   :  { %648 = vmatprep.subr.bf16.mxu1 %v798_v62 }
  0xca   :  { %v123_v18 = vshll.u32 %v122_v17, 30  ;;  %v146_v39 = vsub.s32 4, %v122_v17 }
  0xcc   :  { %v124_v19 = vsub.s32 %v120_v15, %v123_v18  ;;  %v147_v42 = vsel %vm62_vm7, %v146_v39, %v122_v17  ;;  %v602_v18 = vld [vmem:[%s894_s2 + $0x1] ss:$0 sm:$0xff] }
  0xcd   :  { %v149_v44 = vsel %vm61_vm8, 0, %v147_v42 }
  0xce   :  { %v126_v20 = vsub.s32 0, %v124_v19  ;;  %v256_v45 = vadd.s32 3, %v149_v44  ;;  %v153_v46 = vand.u32 3, %v149_v44 }
  0xd0   :  { %v577_v21 = vmin.u32 %v126_v20, %v124_v19  ;;  %v257_v47 = vand.u32 3, %v256_v45  ;;  %vm158_vm9 = vcmp.eq.s32.totalorder %v153_v46, 2  ;;  %vm155_vm11 = vcmp.eq.s32.totalorder %v153_v46, 0 }
  0xd1   :  { %vm154_vm13 = vcmp.lt.s32.totalorder %v153_v46, 2 }
  0xd2   :  { %v128_v22 = vclz %v577_v21  ;;  %vm262_vm10 = vcmp.eq.s32.totalorder %v257_v47, 2  ;;  %vm259_vm12 = vcmp.eq.s32.totalorder %v257_v47, 0  ;;  %vm258_vm14 = vcmp.lt.s32.totalorder %v257_v47, 2 }
  0xd4   :  { %v578_v23 = vadd.s32 4294967294, %v128_v22 }
  0xd6   :  { %vm579_vm6 = vcmp.lt.s32.totalorder %v578_v23, 0 }
  0xd7   :  { %v131_v24 = vsel %vm579_vm6, 0, %v578_v23 }
  0xd8   :  { %v132_v28 = vsub.s32 32, %v131_v24  ;;  %v136_v29 = vsub.s32 4294967266, %v131_v24  ;;  %v133_v30 = vshll.u32 %v124_v19, %v131_v24 }
  0xda   :  { %v134_v31 = vshrl.u32 %v116_v26, %v132_v28  ;;  %v137_v32 = vadd.s32 127, %v136_v29 }
  0xdc   :  { %v135_v33 = vor.u32 %v134_v31, %v133_v30  ;;  %v138_v34 = vshll.u32 %v137_v32, 23 }
  0xde   :  { %v139_v35 = vor.u32 4788187, %v138_v34  ;;  %v142_v37 = vcvt.s32.f32 %v135_v33 }
  0xe0   :  { %v140_v36 = vand.u32 2147483647, %v139_v35 }
  0xe2   :  { %v143_v38 = vmul.f32 %v142_v37, %v140_v36 }
  0xe4   :  { %v144_v40 = vxor.u32 2147483648, %v143_v38 }
  0xe6   :  { %v145_v41 = vsel %vm62_vm7, %v144_v40, %v143_v38 }
  0xe7   :  { %v148_v43 = vsel %vm61_vm8, %v853_v25, %v145_v41  ;;  %v700_v25 = vld [vmem:[#allocation5 + $0x18] sm:$0xff]  }
  0xe8   :  { %707 = vcosq.f32 %v148_v43  ;;  %649 = vmatpush3.bf16.msra.mxu1 %v700_v25 }
  0xe9   :  { %709 = vsinq.f32 %v148_v43  ;;  %650 = vmatprep.subr.bf16.mxu1 %v798_v62 }
  0xec   :  { %651 = vmatpush3.bf16.msra.mxu1 %v701_v1 }
  0xed   :  { %652 = vmatprep.subr.bf16.mxu1 %v798_v62 }
  0xf0   :  { %653 = vmatpush3.bf16.msra.mxu1 %v702_v2 }
  0xf1   :  { %654 = vmatprep.subr.bf16.mxu1 %v798_v62 }
  0xf2   :  { %v708_v48 = vpop.eup %707 }
  0xf3   :  { %v710_v49 = vpop.eup %709  ;;  %v159_v50 = vxor.u32 2147483648, %v708_v48 }
  0xf4   :  { %v156_v51 = vxor.u32 2147483648, %v710_v49  ;;  %655 = vmatpush3.bf16.msra.mxu1 %v703_v3 }
  0xf5   :  { %v160_v52 = vsel %vm158_vm9, %v159_v50, %v710_v49  ;;  %v264_v27 = vsel %vm262_vm10, %v159_v50, %v710_v49  ;;  %656 = vmatprep.subr.bf16.mxu1 %v798_v62 }
  0xf6   :  { %v157_v53 = vsel %vm155_vm11, %v708_v48, %v156_v51  ;;  %v261_v54 = vsel %vm259_vm12, %v708_v48, %v156_v51 }
  0xf7   :  { %v161_v55 = vsel %vm154_vm13, %v157_v53, %v160_v52  ;;  %v265_v56 = vsel %vm258_vm14, %v261_v54, %v264_v27 }
  0xf8   :  { %v162_v57 = vsel %vm152_vm15, nan, %v161_v55  ;;  %v266_v58 = vsel %vm152_vm15, nan, %v265_v56  ;;  %657 = vmatpush3.bf16.msra.mxu1 %v704_v4 }
  0xf9   :  { %v267_v59 = vpack.c.bf16 %v162_v57, %v162_v57  ;;  %v268_v60 = vpack.c.bf16 %v266_v58, %v266_v58 }
  0xfb   :  { %434 = vmatprep.mubr.bf16.mxu0 %v268_v60 }
  0xfc   :  { %435 = vmatmul.mubr.bf16.vlgmr.msra.gmra.mrb[0].mxu0 %v267_v59 }
 0x1cf   :  { %v627_v5 = vpop.f32.mrb[0].mxu0 }
 0x1d0   :  { %v628_v7 = vpop.f32.mrb[1].mxu0 }
 0x1d1   :  { %v629_v8 = vadd.f32 %v628_v7, %v627_v5  ;;  %v630_v9 = vpop.f32.mrb[2].mxu0 }
 0x1d2   :  { %v631_v10 = vpop.f32.mrb[3].mxu0 }
 0x1d3   :  { %v437_v11 = vadd.f32 %v629_v8, %v584_v6 }
 0x1d5   :  { %v601_v12 = vmul.f32 -1.442695, %v437_v11 }
 0x1d7   :  { %711 = vpow2.f32 %v601_v12 }
 0x1e1   :  { %v712_v13 = vpop.eup %711 }
 0x1e2   :  { %v445_v14 = vadd.f32 1.0, %v712_v13 }
 0x1e4   :  { %713 = vrcp.f32 %v445_v14 }
 0x1ee   :  { %v714_v15 = vpop.eup %713 }
 0x1ef   :  { %v448_v16 = vmul.f32 %v714_v15, %v437_v11 }
 0x1f1   :  { %v449_v17 = vpack.c.bf16 %v448_v16, %v448_v16 }
 0x1f3   :  { %659 = vmatmul.mubr.bf16.vlgmr.msra.gmra.mrb[0].mxu1 %v449_v17 }
 0x2c6   :  { %v553_v19 = vpop.f32.mrb[0].mxu1 }
 0x2c7   :  { %v554_v20 = vadd.f32 %v602_v18, %v553_v19  ;;  %v660_v21 = vpop.f32.mrb[1].mxu1 }
 0x2c8   :  { %v556_v22 = vpop.f32.mrb[2].mxu1 }
 0x2c9   :  { %559 = vst [vmem:[#allocation7] sm:$0xff] %v554_v20  ;;  %v661_v23 = vpop.f32.mrb[3].mxu1 }
 0x2ca   :  { %770 = shalt.err (!%p767_p6)
}
 0x2cb   :  { %s771_s2 = scalar_lea.hbm %s896_s4, 128 }
 0x2cc   :  { %p772_p7 = scmp.ne.s32.totalorder %s896_s4, %s771_s2  ;;  %p775_p8 = scmp.lt.u32.totalorder %s771_s2, %s896_s4 }
 0x2ce   :  { %p777_p9 = pnand %p775_p8, %p772_p7 }
 0x2d0   :  { %780 = shalt.err (!%p777_p9)
}
 0x2d1   :  { %569 = dma.vmem_to_hbm [thread:$0]  %s567_s19, 128, %s896_s4, [#allocation4]  }
 0x2d2   :  { %785 = dma.done.wait [#allocation4], 128  }
 0x2d3   :  { %786 = vsyncadd [#allocation4], 4294967168 }
 0x2d4   :  { %573 = vsyncpa [#allocation3], 1 }
 0x2d5   :  { %574 = vsyncpa [#allocation6], 1 }
 0x2d6   :  { %575 = vsyncpa [#allocation4], 1 }

</bundles_post_ra>
